<compile_context>
chip_gen: v7x
topology: tpu7x:2x2x1
jax: 0.10.0
libtpu: 0.0.40
codegen_flags: <defaults>
</compile_context>

<pallas_src>
import jax
import jax.numpy as jnp
import numpy as np
from jax import lax
from jax.experimental import pallas as pl
from jax.experimental.pallas import tpu as pltpu

# ---- model hyperparameters (small, consistent with the module) ----
BATCH = 2
BLOCK_SIZE = 8        # T (sequence length == block_size so causal mask covers all)
NUM_HEADS = 4
N_EMBD = 32           # C
HEAD_SIZE = N_EMBD // NUM_HEADS
HIDDEN = 4 * N_EMBD   # feed-forward hidden dim (= 128, one full lane row)
LN_EPS = 1e-5


def _layernorm(x, gamma, beta):
    """LayerNorm over the last axis (PyTorch default: biased variance, eps=1e-5)."""
    mu = jnp.mean(x, axis=-1, keepdims=True)
    var = jnp.mean((x - mu) ** 2, axis=-1, keepdims=True)
    return (x - mu) * lax.rsqrt(var + LN_EPS) * gamma + beta


def block_kernel(x_ref, vecs_ref, wqkv_ref, wo_ref, w1_ref, w2_ref, out_ref):
    B, T, C, H, hs = BATCH, BLOCK_SIZE, N_EMBD, NUM_HEADS, HEAD_SIZE
    BT = B * T

    x = x_ref[...].astype(jnp.float32)                 # (B*T, C)

    # Packed small vectors: one (8, HIDDEN) vreg.
    vecs = vecs_ref[...]
    g1, b1 = vecs[0:1, :C], vecs[1:2, :C]
    bo = vecs[2:3, :C]
    g2, b2 = vecs[3:4, :C], vecs[4:5, :C]
    bf2 = vecs[5:6, :C]
    bf1 = vecs[6:7, :]                                  # (1, HIDDEN)

    # ---------- LayerNorm 1 ----------
    xn1 = _layernorm(x, g1, b1)                         # (BT, C)

    # ---------- fused QKV projection ----------
    qkv = jnp.dot(xn1, wqkv_ref[...], preferred_element_type=jnp.float32)   # (BT, 3C)
    q, k, v = qkv[:, 0:C], qkv[:, C:2 * C], qkv[:, 2 * C:3 * C]

    # head-major batched layout: (H*B, T, hs), batch index g = h*B + b
    def to_heads(m):
        s = jnp.stack([m[:, h * hs:(h + 1) * hs] for h in range(H)], axis=0)  # (H, BT, hs)
        return s.reshape(H * B, T, hs)

    qh, kh, vh = to_heads(q), to_heads(k), to_heads(v)

    # ---------- causal multi-head attention (batched over (head, batch)) ----------
    wei = lax.dot_general(qh, kh, (((2,), (2,)), ((0,), (0,))),
                          preferred_element_type=jnp.float32) * (hs ** -0.5)  # (G, T, T)

    rows = lax.broadcasted_iota(jnp.int32, wei.shape, 1)
    cols = lax.broadcasted_iota(jnp.int32, wei.shape, 2)
    wei = jnp.where(cols <= rows, wei, -jnp.inf)

    # numerically-stable softmax over last axis
    m = jnp.max(wei, axis=-1, keepdims=True)
    e = jnp.exp(wei - m)
    p = e / jnp.sum(e, axis=-1, keepdims=True)

    oh = lax.dot_general(p, vh, (((2,), (1,)), ((0,), (0,))),
                         preferred_element_type=jnp.float32)    # (G, T, hs)
    oh = oh.reshape(H, BT, hs)                                  # leading-dim regroup, no concat

    # output projection: sum_h head_h @ Wo[rows of head h]   (replaces concat @ Wo)
    wo = wo_ref[...]
    att = jnp.dot(oh[0], wo[0:hs, :], preferred_element_type=jnp.float32)
    for h in range(1, H):
        att = att + jnp.dot(oh[h], wo[h * hs:(h + 1) * hs, :],
                            preferred_element_type=jnp.float32)
    att = att + bo

    x1 = x + att                                        # residual 1

    # ---------- LayerNorm 2 + FeedForward (Linear -> ReLU -> Linear) ----------
    xn2 = _layernorm(x1, g2, b2)
    h1 = jnp.dot(xn2, w1_ref[...], preferred_element_type=jnp.float32) + bf1   # (BT, HIDDEN)
    h1 = jnp.maximum(h1, 0.0)
    ff = jnp.dot(h1, w2_ref[...], preferred_element_type=jnp.float32) + bf2    # (BT, C)

    out_ref[...] = (x1 + ff).astype(out_ref.dtype)      # residual 2


def transformer_block(x, params):
    B, T, C = x.shape
    (g1, b1, wq, wk, wv, wo, bo, g2, b2, w1, bf1, w2, bf2) = params

    # Fuse the three projection weights into one (C, 3C) matrix.
    wqkv = jnp.concatenate([wq, wk, wv], axis=1)

    # Pack the 7 small vectors into one (8, HIDDEN) array (zero-padded rows).
    def row(v):
        return jnp.pad(v, ((0, 0), (0, HIDDEN - v.shape[1])))
    vecs = jnp.concatenate(
        [row(g1), row(b1), row(bo), row(g2), row(b2), row(bf2),
         bf1, jnp.zeros((1, HIDDEN), x.dtype)], axis=0)          # (8, HIDDEN)

    x2d = x.reshape(B * T, C)   # free XLA reshape outside the kernel

    vmem_spec = pl.BlockSpec(memory_space=pltpu.MemorySpace.VMEM)
    out2d = pl.pallas_call(
        block_kernel,
        out_shape=jax.ShapeDtypeStruct((B * T, C), x.dtype),
        in_specs=[vmem_spec] * 6,
        out_specs=vmem_spec,
    )(x2d, vecs, wqkv, wo, w1, w2)
    return out2d.reshape(B, T, C)


# ---------- pure-JAX reference (mirrors the PyTorch module exactly) ----------
def reference_block(x, params):
    (g1, b1, wq, wk, wv, wo, bo, g2, b2, w1, bf1, w2, bf2) = params
    g1, b1, bo, g2, b2, bf1, bf2 = (a[0] for a in (g1, b1, bo, g2, b2, bf1, bf2))

    def ln(z, g, b):
        mu = jnp.mean(z, axis=-1, keepdims=True)
        var = jnp.mean((z - mu) ** 2, axis=-1, keepdims=True)
        return (z - mu) / jnp.sqrt(var + LN_EPS) * g + b

    xn1 = ln(x, g1, b1)
    q = xn1 @ wq
    k = xn1 @ wk
    v = xn1 @ wv
    T = x.shape[1]
    tril = jnp.tril(jnp.ones((T, T), bool))
    outs = []
    for h in range(NUM_HEADS):
        lo, hi = h * HEAD_SIZE, (h + 1) * HEAD_SIZE
        wei = q[..., lo:hi] @ jnp.swapaxes(k[..., lo:hi], -2, -1) * HEAD_SIZE ** -0.5
        wei = jnp.where(tril, wei, -jnp.inf)
        wei = jax.nn.softmax(wei, axis=-1)
        outs.append(wei @ v[..., lo:hi])
    att = jnp.concatenate(outs, axis=-1) @ wo + bo
    x1 = x + att
    xn2 = ln(x1, g2, b2)
    ff = jnp.maximum(xn2 @ w1 + bf1, 0.0) @ w2 + bf2
    return x1 + ff


def make_params(key):
    ks = jax.random.split(key, 8)
    scale = 0.05
    params = (
        jnp.ones((1, N_EMBD), jnp.float32),                                   # ln1 gamma
        jnp.zeros((1, N_EMBD), jnp.float32),                                  # ln1 beta
        scale * jax.random.normal(ks[0], (N_EMBD, N_EMBD), jnp.float32),      # Wq (heads concat)
        scale * jax.random.normal(ks[1], (N_EMBD, N_EMBD), jnp.float32),      # Wk
        scale * jax.random.normal(ks[2], (N_EMBD, N_EMBD), jnp.float32),      # Wv
        scale * jax.random.normal(ks[3], (N_EMBD, N_EMBD), jnp.float32),      # Wproj
        scale * jax.random.normal(ks[4], (1, N_EMBD), jnp.float32),           # bproj
        jnp.ones((1, N_EMBD), jnp.float32),                                   # ln2 gamma
        jnp.zeros((1, N_EMBD), jnp.float32),                                  # ln2 beta
        scale * jax.random.normal(ks[5], (N_EMBD, HIDDEN), jnp.float32),      # W1
        scale * jax.random.normal(ks[6], (1, HIDDEN), jnp.float32),           # b1
        scale * jax.random.normal(ks[7], (HIDDEN, N_EMBD), jnp.float32),      # W2
        jnp.zeros((1, N_EMBD), jnp.float32),                                  # b2
    )
    return params


if __name__ == "__main__":
    key = jax.random.PRNGKey(0)
    kx, kp = jax.random.split(key)
    x = jax.random.normal(kx, (BATCH, BLOCK_SIZE, N_EMBD), jnp.float32)
    params = make_params(kp)

    out = transformer_block(x, params)
    out = jax.block_until_ready(out)

    ref = reference_block(x, params)
    np.testing.assert_allclose(np.asarray(out), np.asarray(ref), rtol=1e-5, atol=1e-5)

    print("KERNEL_OK")
</pallas_src>

<mosaic_0001>
module attributes {stable_mosaic.version = 11 : i64} {
  func.func @block_kernel(%arg0: memref<16x32xf32, #tpu.memory_space<vmem>>, %arg1: memref<8x128xf32, #tpu.memory_space<vmem>>, %arg2: memref<32x96xf32, #tpu.memory_space<vmem>>, %arg3: memref<32x32xf32, #tpu.memory_space<vmem>>, %arg4: memref<32x128xf32, #tpu.memory_space<vmem>>, %arg5: memref<128x32xf32, #tpu.memory_space<vmem>>, %arg6: memref<16x32xf32, #tpu.memory_space<vmem>>) attributes {dimension_semantics = [], scalar_prefetch = 0 : i64, scratch_operands = 0 : i64, tpu.core_type = #tpu.core_type<tc>} {
    %c0 = arith.constant 0 : index
    %c0_0 = arith.constant 0 : index
    %0 = vector.load %arg0[%c0, %c0_0] : memref<16x32xf32, #tpu.memory_space<vmem>>, vector<16x32xf32>
    %c0_1 = arith.constant 0 : index
    %c0_2 = arith.constant 0 : index
    %1 = vector.load %arg1[%c0_1, %c0_2] : memref<8x128xf32, #tpu.memory_space<vmem>>, vector<8x128xf32>
    %2 = vector.extract_strided_slice %1 {offsets = [0, 0], sizes = [1, 32], strides = [1, 1]} : vector<8x128xf32> to vector<1x32xf32>
    %3 = vector.extract_strided_slice %1 {offsets = [1, 0], sizes = [1, 32], strides = [1, 1]} : vector<8x128xf32> to vector<1x32xf32>
    %4 = vector.extract_strided_slice %1 {offsets = [2, 0], sizes = [1, 32], strides = [1, 1]} : vector<8x128xf32> to vector<1x32xf32>
    %5 = vector.extract_strided_slice %1 {offsets = [3, 0], sizes = [1, 32], strides = [1, 1]} : vector<8x128xf32> to vector<1x32xf32>
    %6 = vector.extract_strided_slice %1 {offsets = [4, 0], sizes = [1, 32], strides = [1, 1]} : vector<8x128xf32> to vector<1x32xf32>
    %7 = vector.extract_strided_slice %1 {offsets = [5, 0], sizes = [1, 32], strides = [1, 1]} : vector<8x128xf32> to vector<1x32xf32>
    %8 = vector.extract_strided_slice %1 {offsets = [6, 0], sizes = [1, 128], strides = [1, 1]} : vector<8x128xf32> to vector<1x128xf32>
    %cst = arith.constant dense<0.000000e+00> : vector<16xf32>
    %9 = vector.multi_reduction <add>, %0, %cst [1] : vector<16x32xf32> to vector<16xf32>
    %10 = vector.shape_cast %9 : vector<16xf32> to vector<16x1xf32>
    %cst_3 = arith.constant 3.200000e+01 : f32
    %11 = vector.broadcast %cst_3 : f32 to vector<16x1xf32>
    %12 = arith.divf %10, %11 : vector<16x1xf32>
    %13 = vector.broadcast %12 : vector<16x1xf32> to vector<16x32xf32>
    %14 = arith.subf %0, %13 : vector<16x32xf32>
    %15 = arith.mulf %14, %14 : vector<16x32xf32>
    %cst_4 = arith.constant dense<0.000000e+00> : vector<16xf32>
    %16 = vector.multi_reduction <add>, %15, %cst_4 [1] : vector<16x32xf32> to vector<16xf32>
    %17 = vector.shape_cast %16 : vector<16xf32> to vector<16x1xf32>
    %cst_5 = arith.constant 3.200000e+01 : f32
    %18 = vector.broadcast %cst_5 : f32 to vector<16x1xf32>
    %19 = arith.divf %17, %18 : vector<16x1xf32>
    %20 = vector.broadcast %12 : vector<16x1xf32> to vector<16x32xf32>
    %21 = arith.subf %0, %20 : vector<16x32xf32>
    %cst_6 = arith.constant 9.99999974E-6 : f32
    %22 = vector.broadcast %cst_6 : f32 to vector<16x1xf32>
    %23 = arith.addf %19, %22 : vector<16x1xf32>
    %24 = math.rsqrt %23 : vector<16x1xf32>
    %25 = vector.broadcast %24 : vector<16x1xf32> to vector<16x32xf32>
    %26 = arith.mulf %21, %25 : vector<16x32xf32>
    %27 = vector.broadcast %2 : vector<1x32xf32> to vector<16x32xf32>
    %28 = arith.mulf %26, %27 : vector<16x32xf32>
    %29 = vector.broadcast %3 : vector<1x32xf32> to vector<16x32xf32>
    %30 = arith.addf %28, %29 : vector<16x32xf32>
    %c0_7 = arith.constant 0 : index
    %c0_8 = arith.constant 0 : index
    %31 = vector.load %arg2[%c0_7, %c0_8] : memref<32x96xf32, #tpu.memory_space<vmem>>, vector<32x96xf32>
    %cst_9 = arith.constant dense<0.000000e+00> : vector<16x96xf32>
    %32 = tpu.matmul %30, %31, %cst_9 {dimension_numbers = #tpu.dot_dimension_numbers<[1], [0], [0], [1], [0, 0, 1, 1], [], []>} : vector<16x32xf32>, vector<32x96xf32>, vector<16x96xf32> -> vector<16x96xf32>
    %33 = vector.extract_strided_slice %32 {offsets = [0, 0], sizes = [16, 32], strides = [1, 1]} : vector<16x96xf32> to vector<16x32xf32>
    %34 = vector.extract_strided_slice %32 {offsets = [0, 32], sizes = [16, 32], strides = [1, 1]} : vector<16x96xf32> to vector<16x32xf32>
    %35 = vector.extract_strided_slice %32 {offsets = [0, 64], sizes = [16, 32], strides = [1, 1]} : vector<16x96xf32> to vector<16x32xf32>
    %36 = vector.extract_strided_slice %33 {offsets = [0, 0], sizes = [16, 8], strides = [1, 1]} : vector<16x32xf32> to vector<16x8xf32>
    %37 = vector.extract_strided_slice %33 {offsets = [0, 8], sizes = [16, 8], strides = [1, 1]} : vector<16x32xf32> to vector<16x8xf32>
    %38 = vector.extract_strided_slice %33 {offsets = [0, 16], sizes = [16, 8], strides = [1, 1]} : vector<16x32xf32> to vector<16x8xf32>
    %39 = vector.extract_strided_slice %33 {offsets = [0, 24], sizes = [16, 8], strides = [1, 1]} : vector<16x32xf32> to vector<16x8xf32>
    %40 = vector.shape_cast %36 : vector<16x8xf32> to vector<1x16x8xf32>
    %41 = vector.shape_cast %37 : vector<16x8xf32> to vector<1x16x8xf32>
    %42 = vector.shape_cast %38 : vector<16x8xf32> to vector<1x16x8xf32>
    %43 = vector.shape_cast %39 : vector<16x8xf32> to vector<1x16x8xf32>
    %44 = tpu.concatenate %40, %41, %42, %43 in 0 : vector<1x16x8xf32>, vector<1x16x8xf32>, vector<1x16x8xf32>, vector<1x16x8xf32> -> vector<4x16x8xf32>
    %45 = vector.shape_cast %44 : vector<4x16x8xf32> to vector<8x8x8xf32>
    %46 = vector.extract_strided_slice %34 {offsets = [0, 0], sizes = [16, 8], strides = [1, 1]} : vector<16x32xf32> to vector<16x8xf32>
    %47 = vector.extract_strided_slice %34 {offsets = [0, 8], sizes = [16, 8], strides = [1, 1]} : vector<16x32xf32> to vector<16x8xf32>
    %48 = vector.extract_strided_slice %34 {offsets = [0, 16], sizes = [16, 8], strides = [1, 1]} : vector<16x32xf32> to vector<16x8xf32>
    %49 = vector.extract_strided_slice %34 {offsets = [0, 24], sizes = [16, 8], strides = [1, 1]} : vector<16x32xf32> to vector<16x8xf32>
    %50 = vector.shape_cast %46 : vector<16x8xf32> to vector<1x16x8xf32>
    %51 = vector.shape_cast %47 : vector<16x8xf32> to vector<1x16x8xf32>
    %52 = vector.shape_cast %48 : vector<16x8xf32> to vector<1x16x8xf32>
    %53 = vector.shape_cast %49 : vector<16x8xf32> to vector<1x16x8xf32>
    %54 = tpu.concatenate %50, %51, %52, %53 in 0 : vector<1x16x8xf32>, vector<1x16x8xf32>, vector<1x16x8xf32>, vector<1x16x8xf32> -> vector<4x16x8xf32>
    %55 = vector.shape_cast %54 : vector<4x16x8xf32> to vector<8x8x8xf32>
    %56 = vector.extract_strided_slice %35 {offsets = [0, 0], sizes = [16, 8], strides = [1, 1]} : vector<16x32xf32> to vector<16x8xf32>
    %57 = vector.extract_strided_slice %35 {offsets = [0, 8], sizes = [16, 8], strides = [1, 1]} : vector<16x32xf32> to vector<16x8xf32>
    %58 = vector.extract_strided_slice %35 {offsets = [0, 16], sizes = [16, 8], strides = [1, 1]} : vector<16x32xf32> to vector<16x8xf32>
    %59 = vector.extract_strided_slice %35 {offsets = [0, 24], sizes = [16, 8], strides = [1, 1]} : vector<16x32xf32> to vector<16x8xf32>
    %60 = vector.shape_cast %56 : vector<16x8xf32> to vector<1x16x8xf32>
    %61 = vector.shape_cast %57 : vector<16x8xf32> to vector<1x16x8xf32>
    %62 = vector.shape_cast %58 : vector<16x8xf32> to vector<1x16x8xf32>
    %63 = vector.shape_cast %59 : vector<16x8xf32> to vector<1x16x8xf32>
    %64 = tpu.concatenate %60, %61, %62, %63 in 0 : vector<1x16x8xf32>, vector<1x16x8xf32>, vector<1x16x8xf32>, vector<1x16x8xf32> -> vector<4x16x8xf32>
    %65 = vector.shape_cast %64 : vector<4x16x8xf32> to vector<8x8x8xf32>
    %cst_10 = arith.constant dense<0.000000e+00> : vector<8x8x8xf32>
    %66 = tpu.matmul %45, %55, %cst_10 {dimension_numbers = #tpu.dot_dimension_numbers<[2], [2], [1], [1], [0, 0, 0, 1, 1, 1], [0], [0]>} : vector<8x8x8xf32>, vector<8x8x8xf32>, vector<8x8x8xf32> -> vector<8x8x8xf32>
    %cst_11 = arith.constant 0.353553385 : f32
    %67 = vector.broadcast %cst_11 : f32 to vector<8x8x8xf32>
    %68 = arith.mulf %66, %67 : vector<8x8x8xf32>
    %69 = tpu.iota {dimensions = array<i32: 1>} : vector<8x8x8xi32>
    %70 = tpu.iota {dimensions = array<i32: 2>} : vector<8x8x8xi32>
    %71 = arith.cmpi sle, %70, %69 : vector<8x8x8xi32>
    %cst_12 = arith.constant 0xFF800000 : f32
    %72 = vector.broadcast %cst_12 : f32 to vector<8x8x8xf32>
    %73 = arith.select %71, %68, %72 : vector<8x8x8xi1>, vector<8x8x8xf32>
    %cst_13 = arith.constant dense<0xFF800000> : vector<8x8xf32>
    %74 = vector.multi_reduction <maximumf>, %73, %cst_13 [2] : vector<8x8x8xf32> to vector<8x8xf32>
    %75 = vector.shape_cast %74 : vector<8x8xf32> to vector<8x8x1xf32>
    %76 = vector.broadcast %75 : vector<8x8x1xf32> to vector<8x8x8xf32>
    %77 = arith.subf %73, %76 : vector<8x8x8xf32>
    %78 = math.exp %77 : vector<8x8x8xf32>
    %cst_14 = arith.constant dense<0.000000e+00> : vector<8x8xf32>
    %79 = vector.multi_reduction <add>, %78, %cst_14 [2] : vector<8x8x8xf32> to vector<8x8xf32>
    %80 = vector.shape_cast %79 : vector<8x8xf32> to vector<8x8x1xf32>
    %81 = vector.broadcast %80 : vector<8x8x1xf32> to vector<8x8x8xf32>
    %82 = arith.divf %78, %81 : vector<8x8x8xf32>
    %cst_15 = arith.constant dense<0.000000e+00> : vector<8x8x8xf32>
    %83 = tpu.matmul %82, %65, %cst_15 {dimension_numbers = #tpu.dot_dimension_numbers<[2], [1], [1], [2], [0, 0, 0, 1, 1, 2], [0], [0]>} : vector<8x8x8xf32>, vector<8x8x8xf32>, vector<8x8x8xf32> -> vector<8x8x8xf32>
    %84 = vector.shape_cast %83 : vector<8x8x8xf32> to vector<4x16x8xf32>
    %c0_16 = arith.constant 0 : index
    %c0_17 = arith.constant 0 : index
    %85 = vector.load %arg3[%c0_16, %c0_17] : memref<32x32xf32, #tpu.memory_space<vmem>>, vector<32x32xf32>
    %86 = vector.extract_strided_slice %84 {offsets = [0, 0, 0], sizes = [1, 16, 8], strides = [1, 1, 1]} : vector<4x16x8xf32> to vector<1x16x8xf32>
    %87 = vector.shape_cast %86 : vector<1x16x8xf32> to vector<16x8xf32>
    %88 = vector.extract_strided_slice %85 {offsets = [0, 0], sizes = [8, 32], strides = [1, 1]} : vector<32x32xf32> to vector<8x32xf32>
    %cst_18 = arith.constant dense<0.000000e+00> : vector<16x32xf32>
    %89 = tpu.matmul %87, %88, %cst_18 {dimension_numbers = #tpu.dot_dimension_numbers<[1], [0], [0], [1], [0, 0, 1, 1], [], []>} : vector<16x8xf32>, vector<8x32xf32>, vector<16x32xf32> -> vector<16x32xf32>
    %90 = vector.extract_strided_slice %84 {offsets = [1, 0, 0], sizes = [1, 16, 8], strides = [1, 1, 1]} : vector<4x16x8xf32> to vector<1x16x8xf32>
    %91 = vector.shape_cast %90 : vector<1x16x8xf32> to vector<16x8xf32>
    %92 = vector.extract_strided_slice %85 {offsets = [8, 0], sizes = [8, 32], strides = [1, 1]} : vector<32x32xf32> to vector<8x32xf32>
    %cst_19 = arith.constant dense<0.000000e+00> : vector<16x32xf32>
    %93 = tpu.matmul %91, %92, %cst_19 {dimension_numbers = #tpu.dot_dimension_numbers<[1], [0], [0], [1], [0, 0, 1, 1], [], []>} : vector<16x8xf32>, vector<8x32xf32>, vector<16x32xf32> -> vector<16x32xf32>
    %94 = arith.addf %89, %93 : vector<16x32xf32>
    %95 = vector.extract_strided_slice %84 {offsets = [2, 0, 0], sizes = [1, 16, 8], strides = [1, 1, 1]} : vector<4x16x8xf32> to vector<1x16x8xf32>
    %96 = vector.shape_cast %95 : vector<1x16x8xf32> to vector<16x8xf32>
    %97 = vector.extract_strided_slice %85 {offsets = [16, 0], sizes = [8, 32], strides = [1, 1]} : vector<32x32xf32> to vector<8x32xf32>
    %cst_20 = arith.constant dense<0.000000e+00> : vector<16x32xf32>
    %98 = tpu.matmul %96, %97, %cst_20 {dimension_numbers = #tpu.dot_dimension_numbers<[1], [0], [0], [1], [0, 0, 1, 1], [], []>} : vector<16x8xf32>, vector<8x32xf32>, vector<16x32xf32> -> vector<16x32xf32>
    %99 = arith.addf %94, %98 : vector<16x32xf32>
    %100 = vector.extract_strided_slice %84 {offsets = [3, 0, 0], sizes = [1, 16, 8], strides = [1, 1, 1]} : vector<4x16x8xf32> to vector<1x16x8xf32>
    %101 = vector.shape_cast %100 : vector<1x16x8xf32> to vector<16x8xf32>
    %102 = vector.extract_strided_slice %85 {offsets = [24, 0], sizes = [8, 32], strides = [1, 1]} : vector<32x32xf32> to vector<8x32xf32>
    %cst_21 = arith.constant dense<0.000000e+00> : vector<16x32xf32>
    %103 = tpu.matmul %101, %102, %cst_21 {dimension_numbers = #tpu.dot_dimension_numbers<[1], [0], [0], [1], [0, 0, 1, 1], [], []>} : vector<16x8xf32>, vector<8x32xf32>, vector<16x32xf32> -> vector<16x32xf32>
    %104 = arith.addf %99, %103 : vector<16x32xf32>
    %105 = vector.broadcast %4 : vector<1x32xf32> to vector<16x32xf32>
    %106 = arith.addf %104, %105 : vector<16x32xf32>
    %107 = arith.addf %0, %106 : vector<16x32xf32>
    %cst_22 = arith.constant dense<0.000000e+00> : vector<16xf32>
    %108 = vector.multi_reduction <add>, %107, %cst_22 [1] : vector<16x32xf32> to vector<16xf32>
    %109 = vector.shape_cast %108 : vector<16xf32> to vector<16x1xf32>
    %cst_23 = arith.constant 3.200000e+01 : f32
    %110 = vector.broadcast %cst_23 : f32 to vector<16x1xf32>
    %111 = arith.divf %109, %110 : vector<16x1xf32>
    %112 = vector.broadcast %111 : vector<16x1xf32> to vector<16x32xf32>
    %113 = arith.subf %107, %112 : vector<16x32xf32>
    %114 = arith.mulf %113, %113 : vector<16x32xf32>
    %cst_24 = arith.constant dense<0.000000e+00> : vector<16xf32>
    %115 = vector.multi_reduction <add>, %114, %cst_24 [1] : vector<16x32xf32> to vector<16xf32>
    %116 = vector.shape_cast %115 : vector<16xf32> to vector<16x1xf32>
    %cst_25 = arith.constant 3.200000e+01 : f32
    %117 = vector.broadcast %cst_25 : f32 to vector<16x1xf32>
    %118 = arith.divf %116, %117 : vector<16x1xf32>
    %119 = vector.broadcast %111 : vector<16x1xf32> to vector<16x32xf32>
    %120 = arith.subf %107, %119 : vector<16x32xf32>
    %cst_26 = arith.constant 9.99999974E-6 : f32
    %121 = vector.broadcast %cst_26 : f32 to vector<16x1xf32>
    %122 = arith.addf %118, %121 : vector<16x1xf32>
    %123 = math.rsqrt %122 : vector<16x1xf32>
    %124 = vector.broadcast %123 : vector<16x1xf32> to vector<16x32xf32>
    %125 = arith.mulf %120, %124 : vector<16x32xf32>
    %126 = vector.broadcast %5 : vector<1x32xf32> to vector<16x32xf32>
    %127 = arith.mulf %125, %126 : vector<16x32xf32>
    %128 = vector.broadcast %6 : vector<1x32xf32> to vector<16x32xf32>
    %129 = arith.addf %127, %128 : vector<16x32xf32>
    %c0_27 = arith.constant 0 : index
    %c0_28 = arith.constant 0 : index
    %130 = vector.load %arg4[%c0_27, %c0_28] : memref<32x128xf32, #tpu.memory_space<vmem>>, vector<32x128xf32>
    %cst_29 = arith.constant dense<0.000000e+00> : vector<16x128xf32>
    %131 = tpu.matmul %129, %130, %cst_29 {dimension_numbers = #tpu.dot_dimension_numbers<[1], [0], [0], [1], [0, 0, 1, 1], [], []>} : vector<16x32xf32>, vector<32x128xf32>, vector<16x128xf32> -> vector<16x128xf32>
    %132 = vector.broadcast %8 : vector<1x128xf32> to vector<16x128xf32>
    %133 = arith.addf %131, %132 : vector<16x128xf32>
    %cst_30 = arith.constant 0.000000e+00 : f32
    %134 = vector.broadcast %cst_30 : f32 to vector<16x128xf32>
    %135 = arith.maximumf %133, %134 : vector<16x128xf32>
    %c0_31 = arith.constant 0 : index
    %c0_32 = arith.constant 0 : index
    %136 = vector.load %arg5[%c0_31, %c0_32] : memref<128x32xf32, #tpu.memory_space<vmem>>, vector<128x32xf32>
    %cst_33 = arith.constant dense<0.000000e+00> : vector<16x32xf32>
    %137 = tpu.matmul %135, %136, %cst_33 {dimension_numbers = #tpu.dot_dimension_numbers<[1], [0], [0], [1], [0, 0, 1, 1], [], []>} : vector<16x128xf32>, vector<128x32xf32>, vector<16x32xf32> -> vector<16x32xf32>
    %138 = vector.broadcast %7 : vector<1x32xf32> to vector<16x32xf32>
    %139 = arith.addf %137, %138 : vector<16x32xf32>
    %140 = arith.addf %107, %139 : vector<16x32xf32>
    %c0_34 = arith.constant 0 : index
    %c0_35 = arith.constant 0 : index
    %141 = vector.load %arg6[%c0_34, %c0_35] : memref<16x32xf32, #tpu.memory_space<vmem>>, vector<16x32xf32>
    tpu.vector_store %arg6[%c0_34, %c0_35], %140 {strides = array<i32>} : memref<16x32xf32, #tpu.memory_space<vmem>>, vector<16x32xf32>,
    return
  }
}

</mosaic_0001>

<bundles_post_ra>
// kernel: tpu_custom_call.1
= control target key start
LH: loop header
LB: loop body
LE: loop exit
PB: predicated region body
PF: predicated region fallthrough
CT: control target
= control target key end

     0   :  { %vm27_vm0 = vcmask 261120   ;;  %s2876_s0 = inlined_call_operand.vmem [shape: f32[16,32], index: 0, kind: input, shape index: {}]   ;;  %s2877_s1 = inlined_call_operand.vmem [shape: f32[8,128], index: 1, kind: input, shape index: {}]   ;;  %s2878_s2 = inlined_call_operand.vmem [shape: f32[32,96], index: 2, kind: input, shape index: {}]   ;;  %s2879_s3 = inlined_call_operand.vmem [shape: f32[32,32], index: 3, kind: input, shape index: {}]   ;;  %s2880_s4 = inlined_call_operand.vmem [shape: f32[32,128], index: 4, kind: input, shape index: {}]   ;;  %s2881_s5 = inlined_call_operand.vmem [shape: f32[128,32], index: 5, kind: input, shape index: {}]   ;;  %s2882_s6 = inlined_call_operand.hbm [shape: f32[16,32], index: 6, kind: output, shape index: {}]  }
   0x1   :  { %v2519_v0 = vld [vmem:[%s2876_s0] sm:$0xff]  ;;  %v2524_v1 = vld [vmem:[%s2876_s0 + $0x8] sm:$0xff] }
   0x2   :  { %11 = vsyncpa [#allocation3], 0  ;;  %v28_v2 = vsel %vm27_vm0, %v2519_v0, 0.0  ;;  %v31_v3 = vsel %vm27_vm0, %v2524_v1, 0.0  ;;  %v67_v14 = vld [vmem:[%s2878_s2] sm:$0xff]  ;;  %v68_v15 = vld [vmem:[%s2878_s2 + $0x8] sm:$0xff]  ;;  %v55_v22 = vlaneseq }
   0x3   :  { %29 = vadd.xlane.f32.xlu0 %v28_v2  ;;  %v69_v16 = vld [vmem:[%s2878_s2 + $0x10] sm:$0xff]  ;;  %v2343_v17 = vpack.c.bf16 %v68_v15, %v67_v14  ;;  %v70_v18 = vld [vmem:[%s2878_s2 + $0x18] sm:$0xff]  ;;  %v2553_v29 = vld [vmem:[%s2877_s1] sm:$0xff]  ;;  %v2471_v41 = vmov 0.0   ;;  %vm2472_vm1 = vmmov 0   ;;  %s2473_s1 = smov 120  }
   0x4   :  { %v2347_v19 = vpack.c.bf16 %v70_v18, %v69_v16  ;;  %v2547_v26 = vshrl.u32 %v55_v22, 7  ;;  %2202 = vmatprep.subr.mxu1 %v2471_v41  ;;  %2204 = vmatprep.mubr.msk.f32.mxu1 %vm2472_vm1, %v2471_v41  ;;  %s2474_s9 = smov 112   ;;  %s2475_s10 = smov 104   ;;  %vm168_vm2 = vcmask 64512   ;;  %v786_v58 = vand.u32 127, %v55_v22 }
   0x5   :  { %2344 = vmatprep.subr.bf16.mxu0 %v2343_v17  ;;  %s2476_s11 = smov 96   ;;  %s2477_s12 = smov 64  }
   0x6   :  { %2346 = vmatpush3.bf16.msra.mxu0 %v2343_v17  ;;  %v57_v28 = vsub.s32 0, %v2547_v26  ;;  %v63_v30 = vsub.s32 1, %v2547_v26  ;;  %vm2646_vm3 = vcmp.le.s32.totalorder %v786_v58, %v2547_v26 }
   0x7   :  { %32 = vadd.xlane.f32.xlu0 %v31_v3  ;;  %2348 = vmatprep.subr.bf16.mxu0 %v2347_v19 }
   0x8   :  { %v58_v31 = vrot.slane %v2553_v29, %v57_v28  ;;  %v64_v34 = vrot.slane %v2553_v29, %v63_v30 }
   0xa   :  { %2350 = vmatpush3.bf16.msra.mxu0 %v2347_v19 }
   0xb   :  { %2197 = vmatprep.subr.mxu0 %v2471_v41 }
  0x90   :  { %v30_v4 = vpop.xlane.xlu0 %29 }
  0x91   :  { %v35_v5 = vmul.f32 0.03125, %v30_v4 }
  0x93   :  { %v37_v6 = vsub.f32 %v2519_v0, %v35_v5 }
  0x94   :  { %v33_v7 = vpop.xlane.xlu0 %32 }
  0x95   :  { %v36_v8 = vmul.f32 0.03125, %v33_v7  ;;  %v39_v9 = vmul.f32 %v37_v6, %v37_v6 }
  0x97   :  { %v38_v10 = vsub.f32 %v2524_v1, %v36_v8  ;;  %v41_v11 = vsel %vm27_vm0, %v39_v9, 0.0 }
  0x98   :  { %42 = vadd.xlane.f32.xlu1 %v41_v11 }
  0x99   :  { %v40_v12 = vmul.f32 %v38_v10, %v38_v10 }
  0x9b   :  { %v44_v13 = vsel %vm27_vm0, %v40_v12, 0.0 }
  0x9c   :  { %45 = vadd.xlane.f32.xlu1 %v44_v13 }
 0x125   :  { %v43_v20 = vpop.xlane.xlu1 %42 }
 0x126   :  { %v47_v21 = vmul.f32 0.03125, %v43_v20 }
 0x128   :  { %v49_v23 = vadd.f32 1e-05, %v47_v21 }
 0x129   :  { %v46_v24 = vpop.xlane.xlu1 %45 }
 0x12a   :  { %2407 = vrsqrt.f32 %v49_v23  ;;  %v48_v25 = vmul.f32 0.03125, %v46_v24 }
 0x12c   :  { %v50_v27 = vadd.f32 1e-05, %v48_v25 }
 0x12e   :  { %2409 = vrsqrt.f32 %v50_v27 }
 0x134   :  { %v2408_v32 = vpop.eup %2407 }
 0x135   :  { %v53_v33 = vmul.f32 %v2408_v32, %v37_v6 }
 0x137   :  { %v59_v35 = vmul.f32 %v58_v31, %v53_v33 }
 0x138   :  { %v2410_v36 = vpop.eup %2409 }
 0x139   :  { %v54_v37 = vmul.f32 %v2410_v36, %v38_v10  ;;  %v65_v38 = vadd.f32 %v64_v34, %v59_v35 }
 0x13b   :  { %v60_v39 = vmul.f32 %v58_v31, %v54_v37  ;;  %2194 = vmatprep.mubr.msk.f32.mxu0 %vm27_vm0, %v65_v38 }
 0x13d   :  { %v66_v40 = vadd.f32 %v64_v34, %v60_v39 }
 0x13f   :  { %2195 = vmatmul.mubr.msk.f32.vlgmr.msra.gmra.mrb[0].mxu0 %vm27_vm0, %v66_v40 }
 0x140   :  { %2199 = vmatprep.mubr.msk.f32.mxu0 %vm2472_vm1, %v2471_v41 }
 0x212   :  { %v2566_v42 = vpop.f32.mrb[0].mxu0 }
 0x213   :  { %156 = vrot.lane.b32.xlu1 %v2566_v42, %s2473_s1  ;;  %v2569_v43 = vpop.f32.mrb[1].mxu0 }
 0x214   :  { %154 = vrot.lane.b32.xlu0 %v2569_v43, %s2473_s1 }
 0x217   :  { %158 = vrot.lane.b32.xlu1 %v2569_v43, %s2474_s9 }
 0x218   :  { %162 = vrot.lane.b32.xlu0 %v2569_v43, %s2475_s10 }
 0x21b   :  { %160 = vrot.lane.b32.xlu1 %v2566_v42, %s2474_s9 }
 0x21c   :  { %166 = vrot.lane.b32.xlu0 %v2569_v43, %s2476_s11 }
 0x21f   :  { %164 = vrot.lane.b32.xlu1 %v2566_v42, %s2475_s10 }
 0x223   :  { %243 = vrot.lane.b32.xlu1 %v2566_v42, %s2476_s11 }
 0x285   :  { %v2578_v44 = vpop.permute.xlu1 %156 }
 0x286   :  { %395 = vrot.lane.b32.xlu1 %v2578_v44, %s2476_s11  ;;  %v2581_v45 = vpop.permute.xlu0 %154 }
 0x287   :  { %319 = vrot.lane.b32.xlu0 %v2581_v45, %s2476_s11 }
 0x289   :  { %v2584_v46 = vpop.permute.xlu1 %158 }
 0x28a   :  { %v2586_v47 = vpop.permute.xlu0 %162 }
 0x28b   :  { %471 = vrot.lane.b32.xlu0 %v2584_v46, %s2476_s11 }
 0x28d   :  { %v2589_v48 = vpop.permute.xlu1 %160 }
 0x28e   :  { %547 = vrot.lane.b32.xlu1 %v2589_v48, %s2476_s11  ;;  %v167_v49 = vpop.permute.xlu0 %166 }
 0x28f   :  { %623 = vrot.lane.b32.xlu0 %v2586_v47, %s2476_s11  ;;  %2198 = vmatpush3.xpose.msk.msra.mxu0 %vm168_vm2, %v167_v49 }
 0x290   :  { %2207 = vmatprep.subr.mxu0 %v2471_v41 }
 0x291   :  { %v2595_v50 = vpop.permute.xlu1 %164 }
 0x292   :  { %699 = vrot.lane.b32.xlu1 %v2595_v50, %s2476_s11  ;;  %2200 = vmatmul.mubr.msk.f32.vlgmr.msra.gmra.mrb[2].mxu0 %vm168_vm2, %v2569_v43 }
 0x293   :  { %2209 = vmatprep.mubr.msk.f32.mxu0 %vm2472_vm1, %v2471_v41 }
 0x295   :  { %v244_v51 = vpop.permute.xlu1 %243 }
 0x296   :  { %2203 = vmatpush3.xpose.msk.msra.mxu1 %vm168_vm2, %v244_v51 }
 0x297   :  { %2212 = vmatprep.subr.mxu1 %v2471_v41 }
 0x299   :  { %2205 = vmatmul.mubr.msk.f32.vlgmr.msra.gmra.mrb[0].mxu1 %vm168_vm2, %v2566_v42 }
 0x29a   :  { %2214 = vmatprep.mubr.msk.f32.mxu1 %vm2472_vm1, %v2471_v41 }
 0x2f8   :  { %v396_v52 = vpop.permute.xlu1 %395 }
 0x2f9   :  { %2213 = vmatpush3.xpose.msk.msra.mxu1 %vm168_vm2, %v396_v52  ;;  %v320_v53 = vpop.permute.xlu0 %319 }
 0x2fa   :  { %2208 = vmatpush3.xpose.msk.msra.mxu0 %vm168_vm2, %v320_v53  ;;  %2222 = vmatprep.subr.mxu1 %v2471_v41 }
 0x2fb   :  { %2217 = vmatprep.subr.mxu0 %v2471_v41 }
 0x2fc   :  { %2215 = vmatmul.mubr.msk.f32.vlgmr.msra.gmra.mrb[2].mxu1 %vm168_vm2, %v2578_v44 }
 0x2fd   :  { %2210 = vmatmul.mubr.msk.f32.vlgmr.msra.gmra.mrb[4].mxu0 %vm168_vm2, %v2581_v45  ;;  %v472_v54 = vpop.permute.xlu0 %471  ;;  %2224 = vmatprep.mubr.msk.f32.mxu1 %vm2472_vm1, %v2471_v41 }
 0x2fe   :  { %2218 = vmatpush3.xpose.msk.msra.mxu0 %vm168_vm2, %v472_v54  ;;  %2219 = vmatprep.mubr.msk.f32.mxu0 %vm2472_vm1, %v2471_v41 }
 0x2ff   :  { %2227 = vmatprep.subr.mxu0 %v2471_v41 }
 0x300   :  { %v548_v55 = vpop.permute.xlu1 %547 }
 0x301   :  { %2220 = vmatmul.mubr.msk.f32.vlgmr.msra.gmra.mrb[6].mxu0 %vm168_vm2, %v2584_v46  ;;  %2223 = vmatpush3.xpose.msk.msra.mxu1 %vm168_vm2, %v548_v55  ;;  %v624_v56 = vpop.permute.xlu0 %623 }
 0x302   :  { %2228 = vmatpush3.xpose.msk.msra.mxu0 %vm168_vm2, %v624_v56  ;;  %2232 = vmatprep.subr.mxu1 %v2471_v41 }
 0x303   :  { %2229 = vmatprep.mubr.msk.f32.mxu0 %vm2472_vm1, %v2471_v41  ;;  %2237 = vmatprep.subr.mxu0 %v2471_v41 }
 0x304   :  { %2225 = vmatmul.mubr.msk.f32.vlgmr.msra.gmra.mrb[4].mxu1 %vm168_vm2, %v2589_v48  ;;  %v700_v57 = vpop.permute.xlu1 %699 }
 0x305   :  { %2230 = vmatmul.mubr.msk.f32.vlgmr.msra.gmra.mrb[8].mxu0 %vm168_vm2, %v2586_v47  ;;  %2233 = vmatpush3.xpose.msk.msra.mxu1 %vm168_vm2, %v700_v57 }
 0x306   :  { %2234 = vmatprep.mubr.msk.f32.mxu1 %vm2472_vm1, %v2471_v41  ;;  %2242 = vmatprep.subr.mxu1 %v2471_v41 }
 0x307   :  { %2239 = vmatprep.mubr.msk.f32.mxu0 %vm2472_vm1, %v2471_v41 }
 0x308   :  { %2235 = vmatmul.mubr.msk.f32.vlgmr.msra.gmra.mrb[6].mxu1 %vm168_vm2, %v2595_v50 }
 0x309   :  { %2244 = vmatprep.mubr.msk.f32.mxu1 %vm2472_vm1, %v2471_v41 }
 0x365   :  { %v239_v59 = vpop.f32.mrb[2].mxu0 }
 0x366   :  { %v775_v61 = vmul.f32 0.35355338, %v239_v59  ;;  %v2201_v62 = vpop.f32.mrb[3].mxu0 }
 0x368   :  { %v788_v63 = vsel %vm2646_vm3, %v775_v61, -inf }
 0x369   :  { %v796_v2 = vsel %vm168_vm2, %v788_v63, -inf }
 0x36a   :  { %797 = vmax.xlane.f32.xlu0 %v796_v2 }
 0x36c   :  { %v315_v3 = vpop.f32.mrb[0].mxu1 }
 0x36d   :  { %v776_v4 = vmul.f32 0.35355338, %v315_v3  ;;  %v2206_v5 = vpop.f32.mrb[1].mxu1 }
 0x36f   :  { %v789_v6 = vsel %vm2646_vm3, %v776_v4, -inf }
 0x370   :  { %v799_v7 = vsel %vm168_vm2, %v789_v6, -inf }
 0x371   :  { %800 = vmax.xlane.f32.xlu1 %v799_v7 }
 0x3cf   :  { %v467_v8 = vpop.f32.mrb[2].mxu1 }
 0x3d0   :  { %v778_v9 = vmul.f32 0.35355338, %v467_v8  ;;  %v391_v10 = vpop.f32.mrb[4].mxu0  ;;  %v2216_v11 = vpop.f32.mrb[3].mxu1 }
 0x3d1   :  { %v777_v12 = vmul.f32 0.35355338, %v391_v10  ;;  %v2211_v13 = vpop.f32.mrb[5].mxu0 }
 0x3d2   :  { %v791_v14 = vsel %vm2646_vm3, %v778_v9, -inf }
 0x3d3   :  { %v805_v15 = vsel %vm168_vm2, %v791_v14, -inf  ;;  %v790_v17 = vsel %vm2646_vm3, %v777_v12, -inf }
 0x3d4   :  { %806 = vmax.xlane.f32.xlu0 %v805_v15  ;;  %v543_v16 = vpop.f32.mrb[6].mxu0  ;;  %v802_v21 = vsel %vm168_vm2, %v790_v17, -inf }
 0x3d5   :  { %v779_v18 = vmul.f32 0.35355338, %v543_v16  ;;  %v2221_v19 = vpop.f32.mrb[7].mxu0 }
 0x3d7   :  { %v619_v20 = vpop.f32.mrb[4].mxu1  ;;  %v2664_v25 = vsel %vm2646_vm3, %v779_v18, -inf }
 0x3d8   :  { %v780_v22 = vmul.f32 0.35355338, %v619_v20  ;;  %v2226_v23 = vpop.f32.mrb[5].mxu1  ;;  %803 = vmax.xlane.f32.xlu0 %v802_v21  ;;  %v695_v24 = vpop.f32.mrb[8].mxu0  ;;  %v808_v33 = vsel %vm168_vm2, %v2664_v25, -inf }
 0x3d9   :  { %v781_v27 = vmul.f32 0.35355338, %v695_v24  ;;  %v2231_v28 = vpop.f32.mrb[9].mxu0 }
 0x3da   :  { %v2668_v30 = vsel %vm2646_vm3, %v780_v22, -inf }
 0x3db   :  { %v771_v31 = vpop.f32.mrb[6].mxu1  ;;  %v811_v32 = vsel %vm168_vm2, %v2668_v30, -inf  ;;  %v794_v36 = vsel %vm2646_vm3, %v781_v27, -inf }
 0x3dc   :  { %v782_v34 = vmul.f32 0.35355338, %v771_v31  ;;  %812 = vmax.xlane.f32.xlu1 %v811_v32  ;;  %v2236_v35 = vpop.f32.mrb[7].mxu1  ;;  %809 = vmax.xlane.f32.xlu0 %v808_v33  ;;  %v814_v39 = vsel %vm168_vm2, %v794_v36, -inf }
 0x3de   :  { %v795_v37 = vsel %vm2646_vm3, %v782_v34, -inf }
 0x3df   :  { %v817_v38 = vsel %vm168_vm2, %v795_v37, -inf }
 0x3e0   :  { %818 = vmax.xlane.f32.xlu1 %v817_v38  ;;  %815 = vmax.xlane.f32.xlu0 %v814_v39 }
 0x3f1   :  { %960 = vrot.lane.b32.xlu1 %v2566_v42, %s2477_s12 }
 0x3f6   :  { %884 = vrot.lane.b32.xlu0 %v2569_v43, %s2477_s12 }
 0x3f7   :  { %v798_v40 = vpop.xlane.xlu0 %797 }
 0x3f8   :  { %v820_v49 = vsub.f32 %v788_v63, %v798_v40 }
 0x3fa   :  { %v828_v53 = vmul.f32 1.442695, %v820_v49 }
 0x3fc   :  { %2411 = vpow2.f32 %v828_v53 }
 0x3fe   :  { %v801_v51 = vpop.xlane.xlu1 %800 }
 0x3ff   :  { %v821_v52 = vsub.f32 %v789_v6, %v801_v51 }
 0x401   :  { %v830_v54 = vmul.f32 1.442695, %v821_v52 }
 0x403   :  { %2413 = vpow2.f32 %v830_v54 }
 0x406   :  { %v2412_v55 = vpop.eup %2411 }
 0x407   :  { %v844_v58 = vsel %vm168_vm2, %v2412_v55, 0.0 }
 0x40d   :  { %v2414_v56 = vpop.eup %2413 }
 0x40e   :  { %v847_v57 = vsel %vm168_vm2, %v2414_v56, 0.0 }
 0x415   :  { %848 = vadd.xlane.f32.xlu1 %v847_v57  ;;  %845 = vadd.xlane.f32.xlu0 %v844_v58 }
 0x461   :  { %v807_v42 = vpop.xlane.xlu0 %806 }
 0x462   :  { %v823_v59 = vsub.f32 %v791_v14, %v807_v42 }
 0x464   :  { %v834_v60 = vmul.f32 1.442695, %v823_v59 }
 0x465   :  { %v804_v43 = vpop.xlane.xlu0 %803 }
 0x466   :  { %2415 = vpow2.f32 %v834_v60  ;;  %v822_v61 = vsub.f32 %v790_v17, %v804_v43  ;;  %v1493_v43 = vld [vmem:[%s2879_s3 + $0x8] sm:$0xff] }
 0x468   :  { %v832_v62 = vmul.f32 1.442695, %v822_v61  ;;  %v1492_v61 = vld [vmem:[%s2879_s3] sm:$0xff] }
 0x469   :  { %v813_v63 = vpop.xlane.xlu1 %812  ;;  %v810_v2 = vpop.xlane.xlu0 %809 }
 0x46a   :  { %2417 = vpow2.f32 %v832_v62  ;;  %v824_v11 = vsub.f32 %v2664_v25, %v810_v2  ;;  %v825_v12 = vsub.f32 %v2668_v30, %v813_v63 }
 0x46c   :  { %v836_v13 = vmul.f32 1.442695, %v824_v11  ;;  %v838_v15 = vmul.f32 1.442695, %v825_v12 }
 0x46d   :  { %v819_v3 = vpop.xlane.xlu1 %818  ;;  %v816_v4 = vpop.xlane.xlu0 %815 }
 0x46e   :  { %v827_v14 = vsub.f32 %v795_v37, %v819_v3  ;;  %2419 = vpow2.f32 %v836_v13  ;;  %v826_v17 = vsub.f32 %v794_v36, %v816_v4 }
 0x46f   :  { %2421 = vpow2.f32 %v838_v15 }
 0x470   :  { %v2686_v5 = vpop.eup %2415  ;;  %v842_v16 = vmul.f32 1.442695, %v827_v14 }
 0x471   :  { %v961_v6 = vpop.permute.xlu1 %960  ;;  %v885_v7 = vpop.permute.xlu0 %884  ;;  %v853_v8 = vsel %vm168_vm2, %v2686_v5, 0.0 }
 0x472   :  { %2243 = vmatpush3.msra.mxu1 %v961_v6  ;;  %854 = vadd.xlane.f32.xlu1 %v853_v8  ;;  %2423 = vpow2.f32 %v842_v16  ;;  %v1495_v8 = vld [vmem:[%s2879_s3 + $0x18] sm:$0xff] }
 0x473   :  { %2238 = vmatpush3.msra.mxu0 %v885_v7  ;;  %2252 = vmatprep.subr.mxu1 %v2471_v41  ;;  %v1494_v7 = vld [vmem:[%s2879_s3 + $0x10] sm:$0xff] }
 0x474   :  { %v2691_v9 = vpop.eup %2417  ;;  %2247 = vmatprep.subr.mxu0 %v2471_v41 }
 0x475   :  { %v850_v10 = vsel %vm168_vm2, %v2691_v9, 0.0 }
 0x476   :  { %851 = vadd.xlane.f32.xlu0 %v850_v10 }
 0x483   :  { %1112 = vrot.lane.b32.xlu1 %v2578_v44, %s2477_s12  ;;  %v840_v44 = vmul.f32 1.442695, %v826_v17  ;;  %v1826_v17 = vsub.s32 2, %v2547_v26 }
 0x487   :  { %1188 = vrot.lane.b32.xlu1 %v2584_v46, %s2477_s12 }
 0x48b   :  { %1264 = vrot.lane.b32.xlu1 %v2589_v48, %s2477_s12  ;;  %v2420_v48 = vpop.eup %2419 }
 0x48c   :  { %1036 = vrot.lane.b32.xlu0 %v2581_v45, %s2477_s12  ;;  %v2422_v45 = vpop.eup %2421  ;;  %v856_v19 = vsel %vm168_vm2, %v2420_v48, 0.0 }
 0x48d   :  { %v2707_v20 = vpop.eup %2423  ;;  %v859_v24 = vsel %vm168_vm2, %v2422_v45, 0.0 }
 0x48e   :  { %v865_v25 = vsel %vm168_vm2, %v2707_v20, 0.0 }
 0x4a2   :  { %v849_v46 = vpop.xlane.xlu1 %848  ;;  %v846_v18 = vpop.xlane.xlu0 %845 }
 0x4a3   :  { %2425 = vrcp.f32 %v849_v46 }
 0x4a4   :  { %2427 = vrcp.f32 %v846_v18 }
 0x4a5   :  { %2429 = vpow2.f32 %v840_v44  ;;  %v1827_v44 = vrot.slane %v2553_v29, %v1826_v17 }
 0x4ab   :  { %857 = vadd.xlane.f32.xlu0 %v856_v19 }
 0x4ad   :  { %v2426_v21 = vpop.eup %2425 }
 0x4ae   :  { %v2428_v22 = vpop.eup %2427  ;;  %v871_v23 = vmul.f32 %v2426_v21, %v2414_v56 }
 0x4af   :  { %v2430_v27 = vpop.eup %2429  ;;  %v869_v28 = vmul.f32 %v2428_v22, %v2412_v55  ;;  %860 = vadd.xlane.f32.xlu1 %v859_v24  ;;  %866 = vadd.xlane.f32.xlu0 %v865_v25 }
 0x4b0   :  { %2245 = vmatmul.mubr.msk.f32.vlgmr.msra.gmra.mrb[8].mxu1 %vm168_vm2, %v871_v23  ;;  %v862_v30 = vsel %vm168_vm2, %v2430_v27, 0.0 }
 0x4b1   :  { %2240 = vmatmul.mubr.msk.f32.vlgmr.msra.gmra.mrb[10].mxu0 %vm168_vm2, %v869_v28  ;;  %2254 = vmatprep.mubr.msk.f32.mxu1 %vm2472_vm1, %v2471_v41 }
 0x4b2   :  { %2249 = vmatprep.mubr.msk.f32.mxu0 %vm2472_vm1, %v2471_v41 }
 0x4b3   :  { %863 = vadd.xlane.f32.xlu1 %v862_v30 }
 0x4c4   :  { %1416 = vrot.lane.b32.xlu1 %v2595_v50, %s2477_s12 }
 0x4c5   :  { %1340 = vrot.lane.b32.xlu0 %v2586_v47, %s2477_s12 }
 0x4ff   :  { %v855_v31 = vpop.xlane.xlu1 %854 }
 0x500   :  { %2431 = vrcp.f32 %v855_v31 }
 0x503   :  { %v1113_v32 = vpop.permute.xlu1 %1112  ;;  %v852_v33 = vpop.xlane.xlu0 %851 }
 0x504   :  { %2433 = vrcp.f32 %v852_v33  ;;  %2253 = vmatpush3.msra.mxu1 %v1113_v32  ;;  %v1870_v33 = vld [vmem:[%s2880_s4] sm:$0xff] }
 0x505   :  { %2262 = vmatprep.subr.mxu1 %v2471_v41 }
 0x507   :  { %v1189_v34 = vpop.permute.xlu1 %1188  ;;  %v1037_v35 = vpop.permute.xlu0 %1036 }
 0x508   :  { %2248 = vmatpush3.msra.mxu0 %v1037_v35 }
 0x509   :  { %2257 = vmatprep.subr.mxu0 %v2471_v41 }
 0x50a   :  { %v2432_v36 = vpop.eup %2431 }
 0x50b   :  { %v875_v37 = vmul.f32 %v2432_v36, %v2686_v5  ;;  %v1265_v50 = vpop.permute.xlu1 %1264  ;;  %v1872_v36 = vld [vmem:[%s2880_s4 + $0x10] sm:$0xff] }
 0x50d   :  { %2255 = vmatmul.mubr.msk.f32.vlgmr.msra.gmra.mrb[10].mxu1 %vm168_vm2, %v875_v37  ;;  %v1873_v37 = vld [vmem:[%s2880_s4 + $0x18] sm:$0xff] }
 0x50e   :  { %v2434_v47 = vpop.eup %2433  ;;  %2263 = vmatpush3.msra.mxu1 %v1265_v50  ;;  %2264 = vmatprep.mubr.msk.f32.mxu1 %vm2472_vm1, %v2471_v41  ;;  %v2355_v50 = vpack.c.bf16 %v1873_v37, %v1872_v36 }
 0x50f   :  { %v873_v38 = vmul.f32 %v2434_v47, %v2691_v9  ;;  %2272 = vmatprep.subr.mxu1 %v2471_v41  ;;  %v1961_v47 = vld [vmem:[%s2881_s5] sm:$0xff] }
 0x511   :  { %2250 = vmatmul.mubr.msk.f32.vlgmr.msra.gmra.mrb[12].mxu0 %vm168_vm2, %v873_v38  ;;  %v1962_v38 = vld [vmem:[%s2881_s5 + $0x8] sm:$0xff] }
 0x512   :  { %2258 = vmatpush3.msra.mxu0 %v1189_v34  ;;  %2259 = vmatprep.mubr.msk.f32.mxu0 %vm2472_vm1, %v2471_v41  ;;  %v1871_v34 = vld [vmem:[%s2880_s4 + $0x8] sm:$0xff] }
 0x513   :  { %2267 = vmatprep.subr.mxu0 %v2471_v41  ;;  %v2351_v35 = vpack.c.bf16 %v1871_v34, %v1870_v33 }
 0x538   :  { %v858_v39 = vpop.xlane.xlu0 %857 }
 0x539   :  { %2435 = vrcp.f32 %v858_v39  ;;  %v1963_v39 = vld [vmem:[%s2881_s5 + $0x10] sm:$0xff] }
 0x53c   :  { %v861_v40 = vpop.xlane.xlu1 %860  ;;  %v867_v49 = vpop.xlane.xlu0 %866 }
 0x53d   :  { %2437 = vrcp.f32 %v861_v40  ;;  %v2359_v40 = vpack.c.bf16 %v1962_v38, %v1961_v47 }
 0x53e   :  { %2439 = vrcp.f32 %v867_v49  ;;  %v1964_v49 = vld [vmem:[%s2881_s5 + $0x18] sm:$0xff] }
 0x540   :  { %v864_v51 = vpop.xlane.xlu1 %863  ;;  %v1341_v54 = vpop.permute.xlu0 %1340 }
 0x541   :  { %2441 = vrcp.f32 %v864_v51  ;;  %v2363_v51 = vpack.c.bf16 %v1964_v49, %v1963_v39 }
 0x543   :  { %v2436_v52 = vpop.eup %2435 }
 0x544   :  { %v877_v53 = vmul.f32 %v2436_v52, %v2420_v48  ;;  %v1417_v58 = vpop.permute.xlu1 %1416  ;;  %v1965_v52 = vld [vmem:[%s2881_s5 + $0x20] sm:$0xff] }
 0x546   :  { %2260 = vmatmul.mubr.msk.f32.vlgmr.msra.gmra.mrb[14].mxu0 %vm168_vm2, %v877_v53  ;;  %v1966_v53 = vld [vmem:[%s2881_s5 + $0x28] sm:$0xff] }
 0x547   :  { %v2438_v55 = vpop.eup %2437  ;;  %2268 = vmatpush3.msra.mxu0 %v1341_v54  ;;  %2269 = vmatprep.mubr.msk.f32.mxu0 %vm2472_vm1, %v2471_v41  ;;  %v2367_v54 = vpack.c.bf16 %v1966_v53, %v1965_v52 }
 0x548   :  { %v879_v56 = vmul.f32 %v2438_v55, %v2422_v45  ;;  %v2440_v57 = vpop.eup %2439  ;;  %2277 = vmatprep.subr.mxu0 %v1493_v43  ;;  %v1967_v55 = vld [vmem:[%s2881_s5 + $0x30] sm:$0xff] }
 0x549   :  { %v883_v59 = vmul.f32 %v2440_v57, %v2707_v20 }
 0x54a   :  { %2265 = vmatmul.mubr.msk.f32.vlgmr.msra.gmra.mrb[12].mxu1 %vm168_vm2, %v879_v56  ;;  %v1968_v56 = vld [vmem:[%s2881_s5 + $0x38] sm:$0xff] }
 0x54b   :  { %v2442_v42 = vpop.eup %2441  ;;  %2273 = vmatpush3.msra.mxu1 %v1417_v58  ;;  %2274 = vmatprep.mubr.msk.f32.mxu1 %vm2472_vm1, %v2471_v41  ;;  %v2371_v57 = vpack.c.bf16 %v1968_v56, %v1967_v55  ;;  %v1969_v58 = vld [vmem:[%s2881_s5 + $0x40] sm:$0xff] }
 0x54c   :  { %v881_v60 = vmul.f32 %v2442_v42, %v2430_v27  ;;  %2360 = vmatprep.subr.bf16.mxu1 %v2359_v40  ;;  %v1970_v42 = vld [vmem:[%s2881_s5 + $0x48] sm:$0xff] }
 0x54e   :  { %2270 = vmatmul.mubr.msk.f32.vlgmr.msra.gmra.mrb[16].mxu0 %vm168_vm2, %v881_v60  ;;  %2275 = vmatmul.mubr.msk.f32.vlgmr.msra.gmra.mrb[14].mxu1 %vm168_vm2, %v883_v59  ;;  %v2375_v59 = vpack.c.bf16 %v1970_v42, %v1969_v58  ;;  %v1971_v60 = vld [vmem:[%s2881_s5 + $0x50] sm:$0xff] }
 0x54f   :  { %2278 = vmatpush3.msra.mxu0 %v1493_v43  ;;  %2362 = vmatpush3.bf16.msra.mxu1 %v2359_v40  ;;  %v1972_v43 = vld [vmem:[%s2881_s5 + $0x58] sm:$0xff] }
 0x550   :  { %2282 = vmatprep.subr.mxu0 %v1492_v61  ;;  %2364 = vmatprep.subr.bf16.mxu1 %v2363_v51 }
 0x553   :  { %2366 = vmatpush3.bf16.msra.mxu1 %v2363_v51 }
 0x554   :  { %2368 = vmatprep.subr.bf16.mxu1 %v2367_v54 }
 0x557   :  { %2370 = vmatpush3.bf16.msra.mxu1 %v2367_v54 }
 0x558   :  { %2372 = vmatprep.subr.bf16.mxu1 %v2371_v57 }
 0x55b   :  { %2374 = vmatpush3.bf16.msra.mxu1 %v2371_v57 }
 0x55c   :  { %2376 = vmatprep.subr.bf16.mxu1 %v2375_v59 }
 0x55f   :  { %2378 = vmatpush3.bf16.msra.mxu1 %v2375_v59 }
 0x583   :  { %v1032_v62 = vpop.f32.mrb[8].mxu1 }
 0x584   :  { %v956_v41 = vpop.f32.mrb[10].mxu0  ;;  %v2246_v63 = vpop.f32.mrb[9].mxu1 }
 0x585   :  { %v2241_v2 = vpop.f32.mrb[11].mxu0 }
 0x5e0   :  { %v1184_v3 = vpop.f32.mrb[10].mxu1 }
 0x5e1   :  { %v2256_v4 = vpop.f32.mrb[11].mxu1 }
 0x5e4   :  { %v1108_v5 = vpop.f32.mrb[12].mxu0 }
 0x5e5   :  { %v2251_v6 = vpop.f32.mrb[13].mxu0  ;;  %2279 = vmatprep.mubr.msk.f32.mxu0 %vm168_vm2, %v1108_v5 }
 0x5e6   :  { %2280 = vmatmul.mubr.msk.f32.vlgmr.msra.gmra.mrb[18].mxu0 %vm168_vm2, %v1184_v3 }
 0x5e7   :  { %2284 = vmatprep.mubr.msk.f32.mxu0 %vm168_vm2, %v956_v41  ;;  %2283 = vmatpush3.msra.mxu0 %v1492_v61  ;;  %v2379_v61 = vpack.c.bf16 %v1972_v43, %v1971_v60  ;;  %v1974_v41 = vld [vmem:[%s2881_s5 + $0x68] sm:$0xff] }
 0x5e8   :  { %2287 = vmatprep.subr.mxu0 %v1494_v7 }
 0x5e9   :  { %2380 = vmatprep.subr.bf16.mxu1 %v2379_v61 }
 0x5ea   :  { %2382 = vmatpush3.bf16.msra.mxu1 %v2379_v61 }
 0x5ee   :  { %2285 = vmatmul.mubr.msk.f32.vlgmr.msra.gmra.mrb[18].mxu0 %vm168_vm2, %v1032_v62  ;;  %v1973_v62 = vld [vmem:[%s2881_s5 + $0x60] sm:$0xff] }
 0x5ef   :  { %2288 = vmatpush3.msra.mxu0 %v1494_v7  ;;  %v2383_v63 = vpack.c.bf16 %v1974_v41, %v1973_v62 }
 0x5f0   :  { %2292 = vmatprep.subr.mxu0 %v1495_v8 }
 0x5f1   :  { %2384 = vmatprep.subr.bf16.mxu1 %v2383_v63 }
 0x5f2   :  { %2386 = vmatpush3.bf16.msra.mxu1 %v2383_v63 }
 0x619   :  { %v1260_v9 = vpop.f32.mrb[14].mxu0 }
 0x61a   :  { %v2261_v10 = vpop.f32.mrb[15].mxu0  ;;  %2289 = vmatprep.mubr.msk.f32.mxu0 %vm168_vm2, %v1260_v9  ;;  %v1866_v9 = vsub.s32 4, %v2547_v26 }
 0x61d   :  { %v1336_v11 = vpop.f32.mrb[12].mxu1 }
 0x61e   :  { %v2266_v12 = vpop.f32.mrb[13].mxu1  ;;  %2290 = vmatmul.mubr.msk.f32.vlgmr.msra.gmra.mrb[18].mxu0 %vm168_vm2, %v1336_v11 }
 0x61f   :  { %2293 = vmatpush3.msra.mxu0 %v1495_v8  ;;  %v1860_v8 = vsub.s32 3, %v2547_v26 }
 0x620   :  { %2352 = vmatprep.subr.bf16.mxu0 %v2351_v35 }
 0x621   :  { %v1412_v13 = vpop.f32.mrb[16].mxu0  ;;  %v1488_v14 = vpop.f32.mrb[14].mxu1  ;;  %v1861_v10 = vrot.slane %v2553_v29, %v1860_v8 }
 0x622   :  { %v2271_v15 = vpop.f32.mrb[17].mxu0  ;;  %v2276_v16 = vpop.f32.mrb[15].mxu1  ;;  %2294 = vmatprep.mubr.msk.f32.mxu0 %vm168_vm2, %v1412_v13  ;;  %v1867_v13 = vrot.slane %v2553_v29, %v1866_v9 }
 0x626   :  { %2295 = vmatmul.mubr.msk.f32.vlgmr.msra.gmra.mrb[18].mxu0 %vm168_vm2, %v1488_v14 }
 0x627   :  { %2354 = vmatpush3.bf16.msra.mxu0 %v2351_v35 }
 0x628   :  { %2356 = vmatprep.subr.bf16.mxu0 %v2355_v50 }
 0x62b   :  { %2358 = vmatpush3.bf16.msra.mxu0 %v2355_v50 }
 0x6f9   :  { %v2296_v46 = vpop.f32.mrb[18].mxu0 }
 0x6fa   :  { %v1829_v18 = vadd.f32 %v2296_v46, %v1827_v44  ;;  %v1813_v48 = vpop.f32.mrb[19].mxu0 }
 0x6fb   :  { %v1828_v45 = vadd.f32 %v1827_v44, %v1813_v48  ;;  %v1976_v48 = vld [vmem:[%s2881_s5 + $0x78] sm:$0xff] }
 0x6fc   :  { %v2767_v19 = vadd.f32 %v1829_v18, %v2524_v1  ;;  %v1975_v18 = vld [vmem:[%s2881_s5 + $0x70] sm:$0xff]  ;;  %s2478_s5 = smov [#allocation2]  }
 0x6fd   :  { %v2770_v20 = vadd.f32 %v1828_v45, %v2519_v0  ;;  %v2387_v45 = vpack.c.bf16 %v1976_v48, %v1975_v18  ;;  %s2065_s30 = sshll.u32 %s2478_s5, 4  ;;  %s2066_s30 = int_to_ptr.vmem [resolvable:$true] %s2065_s30 }
 0x6fe   :  { %v1835_v21 = vsel %vm27_vm0, %v2767_v19, 0.0  ;;  %s2447_s7 = scalar_lea.vmem %s2066_s30, 256  ;;  %p2452_p1 = scmp.lt.s32.totalorder %s2066_s30, %s2066_s30 }
 0x6ff   :  { %1836 = vadd.xlane.f32.xlu1 %v1835_v21  ;;  %v1832_v22 = vsel %vm27_vm0, %v2770_v20, 0.0  ;;  %2388 = vmatprep.subr.bf16.mxu1 %v2387_v45  ;;  %v1876_v21 = vsub.s32 6, %v2547_v26  ;;  %p2448_p0 = scmp.ne.s32.totalorder %s2066_s30, %s2447_s7  ;;  %p2453_p2 = scmp.lt.s32.totalorder %s2447_s7, %s2447_s7 }
 0x700   :  { %1833 = vadd.xlane.f32.xlu0 %v1832_v22  ;;  %2390 = vmatpush3.bf16.msra.mxu1 %v2387_v45 }
 0x701   :  { %v1877_v22 = vrot.slane %v2553_v29, %v1876_v21  ;;  %p2454_p3 = por %p2453_p2, %p2452_p1 }
 0x703   :  { %p2455_p4 = pnand %p2454_p3, %p2448_p0 }
 0x78c   :  { %v1837_v23 = vpop.xlane.xlu1 %1836 }
 0x78d   :  { %v1839_v24 = vmul.f32 0.03125, %v1837_v23  ;;  %v1834_v25 = vpop.xlane.xlu0 %1833 }
 0x78e   :  { %v1838_v27 = vmul.f32 0.03125, %v1834_v25 }
 0x78f   :  { %v2777_v28 = vsub.f32 %v2767_v19, %v1839_v24 }
 0x790   :  { %v2780_v1 = vsub.f32 %v2770_v20, %v1838_v27 }
 0x791   :  { %v1843_v31 = vmul.f32 %v2777_v28, %v2777_v28 }
 0x792   :  { %v1842_v0 = vmul.f32 %v2780_v1, %v2780_v1 }
 0x793   :  { %v1847_v32 = vsel %vm27_vm0, %v1843_v31, 0.0 }
 0x794   :  { %v1844_v30 = vsel %vm27_vm0, %v1842_v0, 0.0  ;;  %v1979_v0 = vsub.s32 5, %v2547_v26 }
 0x795   :  { %1845 = vadd.xlane.f32.xlu0 %v1844_v30 }
 0x796   :  { %v1980_v30 = vrot.slane %v2553_v29, %v1979_v0 }
 0x799   :  { %1848 = vadd.xlane.f32.xlu0 %v1847_v32 }
 0x822   :  { %v1846_v2 = vpop.xlane.xlu0 %1845 }
 0x823   :  { %v1850_v3 = vmul.f32 0.03125, %v1846_v2 }
 0x825   :  { %v1852_v4 = vadd.f32 1e-05, %v1850_v3 }
 0x826   :  { %v1849_v5 = vpop.xlane.xlu0 %1848 }
 0x827   :  { %2443 = vrsqrt.f32 %v1852_v4  ;;  %v1851_v6 = vmul.f32 0.03125, %v1849_v5 }
 0x829   :  { %v1853_v7 = vadd.f32 1e-05, %v1851_v6 }
 0x82b   :  { %2445 = vrsqrt.f32 %v1853_v7 }
 0x831   :  { %v2444_v11 = vpop.eup %2443 }
 0x832   :  { %v1856_v12 = vmul.f32 %v2444_v11, %v2780_v1 }
 0x834   :  { %v1862_v14 = vmul.f32 %v1861_v10, %v1856_v12 }
 0x835   :  { %v2446_v15 = vpop.eup %2445 }
 0x836   :  { %v1857_v16 = vmul.f32 %v2446_v15, %v2777_v28  ;;  %v1868_v17 = vadd.f32 %v1867_v13, %v1862_v14 }
 0x838   :  { %v1863_v44 = vmul.f32 %v1861_v10, %v1857_v16  ;;  %2305 = vmatprep.mubr.msk.f32.mxu0 %vm27_vm0, %v1868_v17 }
 0x83a   :  { %v1869_v46 = vadd.f32 %v1867_v13, %v1863_v44 }
 0x83c   :  { %2306 = vmatmul.mubr.msk.f32.vlgmr.msra.gmra.mrb[20].mxu0 %vm27_vm0, %v1869_v46 }
 0x90f   :  { %v2307_v23 = vpop.f32.mrb[20].mxu0 }
 0x910   :  { %v1956_v24 = vadd.f32 %v2307_v23, %v1877_v22  ;;  %v1950_v25 = vpop.f32.mrb[21].mxu0 }
 0x911   :  { %v1951_v27 = vadd.f32 %v1950_v25, %v1877_v22 }
 0x912   :  { %v1960_v1 = vmax.f32 %v1956_v24, 0.0 }
 0x913   :  { %v1959_v28 = vmax.f32 %v1951_v27, 0.0 }
 0x915   :  { %2340 = vmatprep.mubr.f32.mxu1 %v1959_v28 }
 0x916   :  { %2341 = vmatmul.mubr.f32.vlgmr.msra.gmra.mrb[16].mxu1 %v1960_v1 }
 0x9e9   :  { %v2342_v31 = vpop.f32.mrb[16].mxu1 }
 0x9ea   :  { %v2053_v32 = vadd.f32 %v2342_v31, %v1980_v30  ;;  %v2047_v33 = vpop.f32.mrb[17].mxu1 }
 0x9eb   :  { %v2048_v34 = vadd.f32 %v2047_v33, %v1980_v30 }
 0x9ec   :  { %v2057_v35 = vadd.f32 %v2053_v32, %v2767_v19 }
 0x9ed   :  { %v2056_v36 = vadd.f32 %v2048_v34, %v2770_v20 }
 0x9ee   :  { %2059 = vst.msk [vmem:[#allocation2 + $0x8] sm:$0xff] %vm27_vm0, %v2057_v35 }
 0x9ef   :  { %2058 = vst.msk [vmem:[#allocation2] sm:$0xff] %vm27_vm0, %v2056_v36 }
 0x9f0   :  { %2458 = shalt.err (!%p2455_p4)
}
 0x9f1   :  { %s2459_s1 = scalar_lea.hbm %s2882_s6, 256 }
 0x9f2   :  { %p2460_p5 = scmp.ne.s32.totalorder %s2882_s6, %s2459_s1  ;;  %p2463_p6 = scmp.lt.u32.totalorder %s2459_s1, %s2882_s6 }
 0x9f4   :  { %p2465_p7 = pnand %p2463_p6, %p2460_p5 }
 0x9f6   :  { %2468 = shalt.err (!%p2465_p7)
}
 0x9f7   :  { %s2479_s12 = smov 128   ;;  %s2480_s13 = smov 8  }
 0x9f8   :  { %2071 = dma.vmem_to_hbm [thread:$0]  %s2066_s30, 256, %s2882_s6, [#allocation3], %s2479_s12, %s2479_s12, %s2480_s13  }
 0x9f9   :  { %2469 = dma.done.wait [#allocation3], 256  }
 0x9fa   :  { %2470 = vsyncadd [#allocation3], 4294967040 }
 0x9fb   :  { %2075 = vsyncpa [#allocation3], 1 }

</bundles_post_ra>
